<compile_context>
chip_gen: v7x
topology: tpu7x:2x2x1
jax: 0.10.0
libtpu: 0.0.40
codegen_flags: <defaults>
</compile_context>

<pallas_src>
import jax
import jax.numpy as jnp
import numpy as np
from jax.experimental import pallas as pl
from jax.experimental.pallas import tpu as pltpu


# ----------------------------------------------------------------------------
# Fused kernel: CustomLinear encode -> nearest-embed quantize -> MLP decode
# ----------------------------------------------------------------------------
def _fused_vqvae_kernel(obs_ref, rep_ref, wflat_ref, bflat_ref,
                        cbt_ref, cb_ref, cbsq_ref,
                        w1_ref, b1_ref, w2_ref, b2_ref, out_ref):
    obs = obs_ref[...]                                   # (TB, D)
    TB = obs.shape[0]
    D, K, C = cb_ref.shape

    # ---- CustomLinear encode, directly in flattened d-major (TB, D*C) layout ----
    # obs is replicated along lanes with a tiny 0/1 matmul (exact; avoids in-kernel
    # lane-splitting reshapes).
    obs_rep = jnp.dot(obs, rep_ref[...], preferred_element_type=jnp.float32)   # (TB, D*C)
    ze_flat = obs_rep * wflat_ref[...] + bflat_ref[...]                        # (TB, D*C)

    cb = cb_ref[...]        # (D, K, C)  gather layout
    cbt = cbt_ref[...]      # (D, C, K)  cross-term layout
    cbsq = cbsq_ref[...]    # (D, K)     precomputed ||codebook||^2

    # ---- per-obs-dim nearest-embed quantization (unrolled; D is small and static) ----
    # dist_d = ||ze_d||^2 + ||cb_d||^2 - 2 * ze_d . cb_d   (all f32)
    zq_parts = []
    for d in range(D):
        ze_d = ze_flat[:, d * C:(d + 1) * C]                                   # (TB, C)
        cross = jnp.dot(ze_d, cbt[d], preferred_element_type=jnp.float32)      # (TB, K)
        ze_sq = jnp.sum(ze_d * ze_d, axis=1, keepdims=True)                    # (TB, 1)
        dist = ze_sq + cbsq[d:d + 1, :] - 2.0 * cross                          # (TB, K)

        iota_k = jax.lax.broadcasted_iota(jnp.int32, dist.shape, 1)            # (TB, K)
        dmin = jnp.min(dist, axis=1, keepdims=True)
        # First-occurrence argmin (matches torch.argmin); clamp guards degenerate rows.
        idx = jnp.min(jnp.where(dist == dmin, iota_k, jnp.int32(K)),
                      axis=1, keepdims=True)                                   # (TB, 1)
        idx = jnp.minimum(idx, K - 1)
        onehot = (idx == iota_k).astype(jnp.float32)                           # (TB, K)
        # Codebook gather as a (TB,K)x(K,C) matmul, already in decoder (d-major) layout.
        zq_parts.append(jnp.dot(onehot, cb[d], preferred_element_type=jnp.float32))

    zq_flat = jnp.concatenate(zq_parts, axis=1)                                # (TB, D*C)

    # ---- FlattenMlp decoder: Linear -> ReLU -> Linear (identity output) ----
    h = jnp.dot(zq_flat, w1_ref[...], preferred_element_type=jnp.float32) + b1_ref[...]
    h = jnp.maximum(h, 0.0)
    recon = jnp.dot(h, w2_ref[...], preferred_element_type=jnp.float32) + b2_ref[...]

    # ---- single lane-dense packed store: [recon | z_e | z_q | zero pad to 128k lanes] ----
    packed = jnp.concatenate([recon, ze_flat, zq_flat], axis=1)
    pad = out_ref.shape[1] - packed.shape[1]
    if pad > 0:
        packed = jnp.concatenate(
            [packed, jnp.zeros((TB, pad), dtype=jnp.float32)], axis=1)
    out_ref[...] = packed


# ----------------------------------------------------------------------------
# Batch-independent constant preparation (pure JAX, done once)
# ----------------------------------------------------------------------------
def prepare_params(params):
    enc_w = params["enc_w"].astype(jnp.float32)              # (D, C)
    enc_b = params["enc_b"].astype(jnp.float32)              # (D, C)
    cb = params["codebook_dkc"].astype(jnp.float32)          # (D, K, C)
    D, K, C = cb.shape
    # rep[d, d*C + c] = 1 : replicates obs[:, d] C times along lanes with one matmul.
    rep = jnp.repeat(jnp.eye(D, dtype=jnp.float32), C, axis=1)      # (D, D*C)
    return {
        "rep": rep,
        "w_flat": enc_w.reshape(1, D * C),
        "b_flat": enc_b.reshape(1, D * C),
        "cb": cb,                                            # (D, K, C)  gather
        "cb_t": jnp.transpose(cb, (0, 2, 1)),                # (D, C, K)  cross term
        "cb_sq": jnp.sum(cb * cb, axis=-1),                  # (D, K)
        "w1": params["w1"].astype(jnp.float32),
        "b1": params["b1"].astype(jnp.float32),
        "w2": params["w2"].astype(jnp.float32),
        "b2": params["b2"].astype(jnp.float32),
    }


def _pick_tb(B):
    """Batch tile: whole batch for tiny B; otherwise >= 2 tiles (so both v7x TensorCores get
    work), tile a multiple of 8 and <= 256 rows. Remainders handled by zero-padding the batch."""
    if B <= 8:
        return max(B, 1)
    tb = min(256, (B + 1) // 2)
    return ((tb + 7) // 8) * 8


# ----------------------------------------------------------------------------
# Forward wrapper
# ----------------------------------------------------------------------------
def vq_vae_forward(prepped, obs):
    B, D = obs.shape
    DC = prepped["w_flat"].shape[1]
    C = DC // D
    out_dim = prepped["w2"].shape[1]
    P = out_dim + 2 * DC
    P_pad = ((P + 127) // 128) * 128              # lane-dense packed output slab

    TB = _pick_tb(B)
    nb = -(-B // TB)
    Bp = nb * TB
    obs_p = obs if Bp == B else jnp.pad(obs, ((0, Bp - B), (0, 0)))

    consts = [prepped[k] for k in
              ("rep", "w_flat", "b_flat", "cb_t", "cb", "cb_sq", "w1", "b1", "w2", "b2")]

    def const_spec(a):
        nd = a.ndim
        return pl.BlockSpec(tuple(a.shape), lambda i: (0,) * nd)

    in_specs = [pl.BlockSpec((TB, D), lambda i: (i, 0))] + [const_spec(a) for a in consts]
    out_specs = pl.BlockSpec((TB, P_pad), lambda i: (i, 0))

    # Explicit VMEM budget: constants + double-buffered tiles + headroom; capped at 64 MiB
    # (v7x physical), floored at 32 MiB (so v5e's 16 MiB scoped default never binds).
    const_bytes = sum(int(a.size) * 4 for a in consts)
    tile_bytes = 4 * TB * (D + P_pad)
    vmem_limit = int(min(64 << 20,
                         max(32 << 20, 2 * (const_bytes + 2 * tile_bytes) + (4 << 20))))

    out = pl.pallas_call(
        _fused_vqvae_kernel,
        out_shape=jax.ShapeDtypeStruct((Bp, P_pad), jnp.float32),
        grid=(nb,),
        in_specs=in_specs,
        out_specs=out_specs,
        compiler_params=pltpu.CompilerParams(
            dimension_semantics=("parallel",),
            vmem_limit_bytes=vmem_limit),
    )(obs_p, *consts)

    recon = out[:B, :out_dim]
    ze_flat = out[:B, out_dim:out_dim + DC]
    zq_flat = out[:B, out_dim + DC:out_dim + 2 * DC]
    # d-major flat (B, D*C) -> (B, C, D); wrapper-side layout plumbing only.
    z_e = ze_flat.reshape(B, D, C).transpose(0, 2, 1)
    emb = zq_flat.reshape(B, D, C).transpose(0, 2, 1)
    return recon, z_e, emb


# ----------------------------------------------------------------------------
# Pure-JAX reference (for correctness check)
# ----------------------------------------------------------------------------
def vq_vae_forward_ref(params, obs):
    B = obs.shape[0]
    D, C = params["enc_w"].shape
    cb = params["codebook_dkc"]
    z_e = obs[:, :, None] * params["enc_w"][None] + params["enc_b"][None]     # (B,D,C)
    dist = jnp.sum((z_e[:, :, None, :] - cb[None]) ** 2, axis=-1)             # (B,D,K)
    idx = jnp.argmin(dist, axis=-1)                                           # (B,D)
    z_q = jnp.take_along_axis(cb[None], idx[:, :, None, None], axis=2)[:, :, 0, :]
    x = z_q.reshape(B, D * C)
    h = jnp.maximum(x @ params["w1"] + params["b1"], 0.0)
    recon = h @ params["w2"] + params["b2"]
    return recon, jnp.transpose(z_e, (0, 2, 1)), jnp.transpose(z_q, (0, 2, 1))


# ----------------------------------------------------------------------------
# Deterministic parameter construction (shapes from VQ_VAE.__init__)
# ----------------------------------------------------------------------------
def make_params(key, obs_dim, code_dim, n_code_each, hidden):
    k = jax.random.split(key, 7)
    # CustomLinear: weights ~ N(1, 0.1) clamped [0.8, 1.2]; bias ~ N(0, 0.1) clamped [-0.2, 0.2]
    enc_w = jnp.clip(jax.random.normal(k[0], (obs_dim, code_dim)) * 0.1 + 1.0, 0.8, 1.2)
    enc_b = jnp.clip(jax.random.normal(k[1], (obs_dim, code_dim)) * 0.1, -0.2, 0.2)
    # NearestEmbed weight: (code_dim, n_code_total); per-dim segments -> (D, K, C)
    n_code_total = obs_dim * n_code_each
    emb_weight = jax.random.uniform(k[2], (code_dim, n_code_total))
    codebook_dkc = emb_weight.T.reshape(obs_dim, n_code_each, code_dim)
    # FlattenMlp(input=code_dim*obs_dim, hidden_sizes=[hidden], output=obs_dim)
    rep_dim = obs_dim * code_dim
    lim1 = 1.0 / np.sqrt(rep_dim)
    w1 = jax.random.uniform(k[3], (rep_dim, hidden), minval=-lim1, maxval=lim1)
    b1 = jnp.full((1, hidden), 0.1, dtype=jnp.float32)
    w2 = jax.random.uniform(k[4], (hidden, obs_dim), minval=-3e-3, maxval=3e-3)
    b2 = jax.random.uniform(k[5], (1, obs_dim), minval=-3e-3, maxval=3e-3)
    return {
        "enc_w": enc_w.astype(jnp.float32),
        "enc_b": enc_b.astype(jnp.float32),
        "codebook_dkc": codebook_dkc.astype(jnp.float32),
        "w1": w1.astype(jnp.float32),
        "b1": b1,
        "w2": w2.astype(jnp.float32),
        "b2": b2.astype(jnp.float32),
    }


if __name__ == "__main__":
    B, OBS_DIM, CODE_DIM, N_CODE_EACH, HIDDEN = 16, 4, 8, 16, 32

    key = jax.random.PRNGKey(0)
    pkey, okey = jax.random.split(key)
    params = make_params(pkey, OBS_DIM, CODE_DIM, N_CODE_EACH, HIDDEN)
    obs = jax.random.normal(okey, (B, OBS_DIM), dtype=jnp.float32)

    prepped = jax.tree_util.tree_map(jax.device_put, prepare_params(params))

    recon, z_e, emb = vq_vae_forward(prepped, obs)
    jax.block_until_ready((recon, z_e, emb))

    recon_ref, z_e_ref, emb_ref = vq_vae_forward_ref(params, obs)
    np.testing.assert_allclose(np.asarray(recon), np.asarray(recon_ref), rtol=1e-5, atol=1e-5)
    np.testing.assert_allclose(np.asarray(z_e), np.asarray(z_e_ref), rtol=1e-5, atol=1e-5)
    np.testing.assert_allclose(np.asarray(emb), np.asarray(emb_ref), rtol=1e-5, atol=1e-5)

    assert recon.shape == (B, OBS_DIM)
    assert z_e.shape == (B, CODE_DIM, OBS_DIM)
    assert emb.shape == (B, CODE_DIM, OBS_DIM)
    print("KERNEL_OK")
</pallas_src>

<mosaic_0001>
module attributes {stable_mosaic.version = 11 : i64} {
  func.func @_fused_vqvae_kernel(%arg0: i32, %arg1: memref<8x4xf32, #tpu.memory_space<vmem>>, %arg2: memref<4x32xf32, #tpu.memory_space<vmem>>, %arg3: memref<1x32xf32, #tpu.memory_space<vmem>>, %arg4: memref<1x32xf32, #tpu.memory_space<vmem>>, %arg5: memref<4x8x16xf32, #tpu.memory_space<vmem>>, %arg6: memref<4x16x8xf32, #tpu.memory_space<vmem>>, %arg7: memref<4x16xf32, #tpu.memory_space<vmem>>, %arg8: memref<32x32xf32, #tpu.memory_space<vmem>>, %arg9: memref<1x32xf32, #tpu.memory_space<vmem>>, %arg10: memref<32x4xf32, #tpu.memory_space<vmem>>, %arg11: memref<1x4xf32, #tpu.memory_space<vmem>>, %arg12: memref<8x128xf32, #tpu.memory_space<vmem>>) attributes {dimension_semantics = [#tpu.dimension_semantics<parallel>], iteration_bounds = array<i64: 2>, scalar_prefetch = 0 : i64, scratch_operands = 0 : i64, tpu.core_type = #tpu.core_type<tc>, window_params = [{transform_indices = @transform_0, window_bounds = array<i64: 8, 4>}, {pipeline_mode = #tpu.pipeline_mode<synchronous>, transform_indices = @transform_1, window_bounds = array<i64: 4, 32>}, {pipeline_mode = #tpu.pipeline_mode<synchronous>, transform_indices = @transform_2, window_bounds = array<i64: 1, 32>}, {pipeline_mode = #tpu.pipeline_mode<synchronous>, transform_indices = @transform_3, window_bounds = array<i64: 1, 32>}, {pipeline_mode = #tpu.pipeline_mode<synchronous>, transform_indices = @transform_4, window_bounds = array<i64: 4, 8, 16>}, {pipeline_mode = #tpu.pipeline_mode<synchronous>, transform_indices = @transform_5, window_bounds = array<i64: 4, 16, 8>}, {pipeline_mode = #tpu.pipeline_mode<synchronous>, transform_indices = @transform_6, window_bounds = array<i64: 4, 16>}, {pipeline_mode = #tpu.pipeline_mode<synchronous>, transform_indices = @transform_7, window_bounds = array<i64: 32, 32>}, {pipeline_mode = #tpu.pipeline_mode<synchronous>, transform_indices = @transform_8, window_bounds = array<i64: 1, 32>}, {pipeline_mode = #tpu.pipeline_mode<synchronous>, transform_indices = @transform_9, window_bounds = array<i64: 32, 4>}, {pipeline_mode = #tpu.pipeline_mode<synchronous>, transform_indices = @transform_10, window_bounds = array<i64: 1, 4>}, {transform_indices = @transform_11, window_bounds = array<i64: 8, 128>}]} {
    %c0 = arith.constant 0 : index
    %c0_0 = arith.constant 0 : index
    %0 = vector.load %arg1[%c0, %c0_0] : memref<8x4xf32, #tpu.memory_space<vmem>>, vector<8x4xf32>
    %c0_1 = arith.constant 0 : index
    %c0_2 = arith.constant 0 : index
    %1 = vector.load %arg2[%c0_1, %c0_2] : memref<4x32xf32, #tpu.memory_space<vmem>>, vector<4x32xf32>
    %cst = arith.constant dense<0.000000e+00> : vector<8x32xf32>
    %2 = tpu.matmul %0, %1, %cst {dimension_numbers = #tpu.dot_dimension_numbers<[1], [0], [0], [1], [0, 0, 1, 1], [], []>} : vector<8x4xf32>, vector<4x32xf32>, vector<8x32xf32> -> vector<8x32xf32>
    %c0_3 = arith.constant 0 : index
    %c0_4 = arith.constant 0 : index
    %3 = vector.load %arg3[%c0_3, %c0_4] : memref<1x32xf32, #tpu.memory_space<vmem>>, vector<1x32xf32>
    %4 = vector.broadcast %3 : vector<1x32xf32> to vector<8x32xf32>
    %5 = arith.mulf %2, %4 : vector<8x32xf32>
    %c0_5 = arith.constant 0 : index
    %c0_6 = arith.constant 0 : index
    %6 = vector.load %arg4[%c0_5, %c0_6] : memref<1x32xf32, #tpu.memory_space<vmem>>, vector<1x32xf32>
    %7 = vector.broadcast %6 : vector<1x32xf32> to vector<8x32xf32>
    %8 = arith.addf %5, %7 : vector<8x32xf32>
    %c0_7 = arith.constant 0 : index
    %c0_8 = arith.constant 0 : index
    %c0_9 = arith.constant 0 : index
    %9 = vector.load %arg6[%c0_7, %c0_8, %c0_9] : memref<4x16x8xf32, #tpu.memory_space<vmem>>, vector<4x16x8xf32>
    %c0_10 = arith.constant 0 : index
    %c0_11 = arith.constant 0 : index
    %c0_12 = arith.constant 0 : index
    %10 = vector.load %arg5[%c0_10, %c0_11, %c0_12] : memref<4x8x16xf32, #tpu.memory_space<vmem>>, vector<4x8x16xf32>
    %c0_13 = arith.constant 0 : index
    %c0_14 = arith.constant 0 : index
    %11 = vector.load %arg7[%c0_13, %c0_14] : memref<4x16xf32, #tpu.memory_space<vmem>>, vector<4x16xf32>
    %12 = vector.extract_strided_slice %8 {offsets = [0, 0], sizes = [8, 8], strides = [1, 1]} : vector<8x32xf32> to vector<8x8xf32>
    %13 = vector.extract_strided_slice %10 {offsets = [0, 0, 0], sizes = [1, 8, 16], strides = [1, 1, 1]} : vector<4x8x16xf32> to vector<1x8x16xf32>
    %14 = vector.shape_cast %13 : vector<1x8x16xf32> to vector<8x16xf32>
    %cst_15 = arith.constant dense<0.000000e+00> : vector<8x16xf32>
    %15 = tpu.matmul %12, %14, %cst_15 {dimension_numbers = #tpu.dot_dimension_numbers<[1], [0], [0], [1], [0, 0, 1, 1], [], []>} : vector<8x8xf32>, vector<8x16xf32>, vector<8x16xf32> -> vector<8x16xf32>
    %16 = arith.mulf %12, %12 : vector<8x8xf32>
    %cst_16 = arith.constant dense<0.000000e+00> : vector<8xf32>
    %17 = vector.multi_reduction <add>, %16, %cst_16 [1] : vector<8x8xf32> to vector<8xf32>
    %18 = vector.shape_cast %17 : vector<8xf32> to vector<8x1xf32>
    %19 = vector.extract_strided_slice %11 {offsets = [0, 0], sizes = [1, 16], strides = [1, 1]} : vector<4x16xf32> to vector<1x16xf32>
    %20 = vector.broadcast %18 : vector<8x1xf32> to vector<8x16xf32>
    %21 = vector.broadcast %19 : vector<1x16xf32> to vector<8x16xf32>
    %22 = arith.addf %20, %21 : vector<8x16xf32>
    %cst_17 = arith.constant 2.000000e+00 : f32
    %23 = vector.broadcast %cst_17 : f32 to vector<8x16xf32>
    %24 = arith.mulf %23, %15 : vector<8x16xf32>
    %25 = arith.subf %22, %24 : vector<8x16xf32>
    %26 = tpu.iota {dimensions = array<i32: 1>} : vector<8x16xi32>
    %cst_18 = arith.constant dense<0x7F800000> : vector<8xf32>
    %27 = vector.multi_reduction <minimumf>, %25, %cst_18 [1] : vector<8x16xf32> to vector<8xf32>
    %28 = vector.shape_cast %27 : vector<8xf32> to vector<8x1xf32>
    %29 = vector.broadcast %28 : vector<8x1xf32> to vector<8x16xf32>
    %30 = arith.cmpf oeq, %25, %29 : vector<8x16xf32>
    %c16_i32 = arith.constant 16 : i32
    %31 = vector.broadcast %c16_i32 : i32 to vector<8x16xi32>
    %32 = arith.select %30, %26, %31 : vector<8x16xi1>, vector<8x16xi32>
    %cst_19 = arith.constant dense<2147483647> : vector<8xi32>
    %33 = vector.multi_reduction <minsi>, %32, %cst_19 [1] : vector<8x16xi32> to vector<8xi32>
    %34 = vector.shape_cast %33 : vector<8xi32> to vector<8x1xi32>
    %c15_i32 = arith.constant 15 : i32
    %35 = vector.broadcast %c15_i32 : i32 to vector<8x1xi32>
    %36 = arith.minsi %34, %35 : vector<8x1xi32>
    %37 = vector.broadcast %36 : vector<8x1xi32> to vector<8x16xi32>
    %38 = arith.cmpi eq, %37, %26 : vector<8x16xi32>
    %39 = arith.extui %38 : vector<8x16xi1> to vector<8x16xi32>
    %40 = arith.sitofp %39 : vector<8x16xi32> to vector<8x16xf32>
    %41 = vector.extract_strided_slice %9 {offsets = [0, 0, 0], sizes = [1, 16, 8], strides = [1, 1, 1]} : vector<4x16x8xf32> to vector<1x16x8xf32>
    %42 = vector.shape_cast %41 : vector<1x16x8xf32> to vector<16x8xf32>
    %cst_20 = arith.constant dense<0.000000e+00> : vector<8x8xf32>
    %43 = tpu.matmul %40, %42, %cst_20 {dimension_numbers = #tpu.dot_dimension_numbers<[1], [0], [0], [1], [0, 0, 1, 1], [], []>} : vector<8x16xf32>, vector<16x8xf32>, vector<8x8xf32> -> vector<8x8xf32>
    %44 = vector.extract_strided_slice %8 {offsets = [0, 8], sizes = [8, 8], strides = [1, 1]} : vector<8x32xf32> to vector<8x8xf32>
    %45 = vector.extract_strided_slice %10 {offsets = [1, 0, 0], sizes = [1, 8, 16], strides = [1, 1, 1]} : vector<4x8x16xf32> to vector<1x8x16xf32>
    %46 = vector.shape_cast %45 : vector<1x8x16xf32> to vector<8x16xf32>
    %cst_21 = arith.constant dense<0.000000e+00> : vector<8x16xf32>
    %47 = tpu.matmul %44, %46, %cst_21 {dimension_numbers = #tpu.dot_dimension_numbers<[1], [0], [0], [1], [0, 0, 1, 1], [], []>} : vector<8x8xf32>, vector<8x16xf32>, vector<8x16xf32> -> vector<8x16xf32>
    %48 = arith.mulf %44, %44 : vector<8x8xf32>
    %cst_22 = arith.constant dense<0.000000e+00> : vector<8xf32>
    %49 = vector.multi_reduction <add>, %48, %cst_22 [1] : vector<8x8xf32> to vector<8xf32>
    %50 = vector.shape_cast %49 : vector<8xf32> to vector<8x1xf32>
    %51 = vector.extract_strided_slice %11 {offsets = [1, 0], sizes = [1, 16], strides = [1, 1]} : vector<4x16xf32> to vector<1x16xf32>
    %52 = vector.broadcast %50 : vector<8x1xf32> to vector<8x16xf32>
    %53 = vector.broadcast %51 : vector<1x16xf32> to vector<8x16xf32>
    %54 = arith.addf %52, %53 : vector<8x16xf32>
    %cst_23 = arith.constant 2.000000e+00 : f32
    %55 = vector.broadcast %cst_23 : f32 to vector<8x16xf32>
    %56 = arith.mulf %55, %47 : vector<8x16xf32>
    %57 = arith.subf %54, %56 : vector<8x16xf32>
    %58 = tpu.iota {dimensions = array<i32: 1>} : vector<8x16xi32>
    %cst_24 = arith.constant dense<0x7F800000> : vector<8xf32>
    %59 = vector.multi_reduction <minimumf>, %57, %cst_24 [1] : vector<8x16xf32> to vector<8xf32>
    %60 = vector.shape_cast %59 : vector<8xf32> to vector<8x1xf32>
    %61 = vector.broadcast %60 : vector<8x1xf32> to vector<8x16xf32>
    %62 = arith.cmpf oeq, %57, %61 : vector<8x16xf32>
    %c16_i32_25 = arith.constant 16 : i32
    %63 = vector.broadcast %c16_i32_25 : i32 to vector<8x16xi32>
    %64 = arith.select %62, %58, %63 : vector<8x16xi1>, vector<8x16xi32>
    %cst_26 = arith.constant dense<2147483647> : vector<8xi32>
    %65 = vector.multi_reduction <minsi>, %64, %cst_26 [1] : vector<8x16xi32> to vector<8xi32>
    %66 = vector.shape_cast %65 : vector<8xi32> to vector<8x1xi32>
    %c15_i32_27 = arith.constant 15 : i32
    %67 = vector.broadcast %c15_i32_27 : i32 to vector<8x1xi32>
    %68 = arith.minsi %66, %67 : vector<8x1xi32>
    %69 = vector.broadcast %68 : vector<8x1xi32> to vector<8x16xi32>
    %70 = arith.cmpi eq, %69, %58 : vector<8x16xi32>
    %71 = arith.extui %70 : vector<8x16xi1> to vector<8x16xi32>
    %72 = arith.sitofp %71 : vector<8x16xi32> to vector<8x16xf32>
    %73 = vector.extract_strided_slice %9 {offsets = [1, 0, 0], sizes = [1, 16, 8], strides = [1, 1, 1]} : vector<4x16x8xf32> to vector<1x16x8xf32>
    %74 = vector.shape_cast %73 : vector<1x16x8xf32> to vector<16x8xf32>
    %cst_28 = arith.constant dense<0.000000e+00> : vector<8x8xf32>
    %75 = tpu.matmul %72, %74, %cst_28 {dimension_numbers = #tpu.dot_dimension_numbers<[1], [0], [0], [1], [0, 0, 1, 1], [], []>} : vector<8x16xf32>, vector<16x8xf32>, vector<8x8xf32> -> vector<8x8xf32>
    %76 = vector.extract_strided_slice %8 {offsets = [0, 16], sizes = [8, 8], strides = [1, 1]} : vector<8x32xf32> to vector<8x8xf32>
    %77 = vector.extract_strided_slice %10 {offsets = [2, 0, 0], sizes = [1, 8, 16], strides = [1, 1, 1]} : vector<4x8x16xf32> to vector<1x8x16xf32>
    %78 = vector.shape_cast %77 : vector<1x8x16xf32> to vector<8x16xf32>
    %cst_29 = arith.constant dense<0.000000e+00> : vector<8x16xf32>
    %79 = tpu.matmul %76, %78, %cst_29 {dimension_numbers = #tpu.dot_dimension_numbers<[1], [0], [0], [1], [0, 0, 1, 1], [], []>} : vector<8x8xf32>, vector<8x16xf32>, vector<8x16xf32> -> vector<8x16xf32>
    %80 = arith.mulf %76, %76 : vector<8x8xf32>
    %cst_30 = arith.constant dense<0.000000e+00> : vector<8xf32>
    %81 = vector.multi_reduction <add>, %80, %cst_30 [1] : vector<8x8xf32> to vector<8xf32>
    %82 = vector.shape_cast %81 : vector<8xf32> to vector<8x1xf32>
    %83 = vector.extract_strided_slice %11 {offsets = [2, 0], sizes = [1, 16], strides = [1, 1]} : vector<4x16xf32> to vector<1x16xf32>
    %84 = vector.broadcast %82 : vector<8x1xf32> to vector<8x16xf32>
    %85 = vector.broadcast %83 : vector<1x16xf32> to vector<8x16xf32>
    %86 = arith.addf %84, %85 : vector<8x16xf32>
    %cst_31 = arith.constant 2.000000e+00 : f32
    %87 = vector.broadcast %cst_31 : f32 to vector<8x16xf32>
    %88 = arith.mulf %87, %79 : vector<8x16xf32>
    %89 = arith.subf %86, %88 : vector<8x16xf32>
    %90 = tpu.iota {dimensions = array<i32: 1>} : vector<8x16xi32>
    %cst_32 = arith.constant dense<0x7F800000> : vector<8xf32>
    %91 = vector.multi_reduction <minimumf>, %89, %cst_32 [1] : vector<8x16xf32> to vector<8xf32>
    %92 = vector.shape_cast %91 : vector<8xf32> to vector<8x1xf32>
    %93 = vector.broadcast %92 : vector<8x1xf32> to vector<8x16xf32>
    %94 = arith.cmpf oeq, %89, %93 : vector<8x16xf32>
    %c16_i32_33 = arith.constant 16 : i32
    %95 = vector.broadcast %c16_i32_33 : i32 to vector<8x16xi32>
    %96 = arith.select %94, %90, %95 : vector<8x16xi1>, vector<8x16xi32>
    %cst_34 = arith.constant dense<2147483647> : vector<8xi32>
    %97 = vector.multi_reduction <minsi>, %96, %cst_34 [1] : vector<8x16xi32> to vector<8xi32>
    %98 = vector.shape_cast %97 : vector<8xi32> to vector<8x1xi32>
    %c15_i32_35 = arith.constant 15 : i32
    %99 = vector.broadcast %c15_i32_35 : i32 to vector<8x1xi32>
    %100 = arith.minsi %98, %99 : vector<8x1xi32>
    %101 = vector.broadcast %100 : vector<8x1xi32> to vector<8x16xi32>
    %102 = arith.cmpi eq, %101, %90 : vector<8x16xi32>
    %103 = arith.extui %102 : vector<8x16xi1> to vector<8x16xi32>
    %104 = arith.sitofp %103 : vector<8x16xi32> to vector<8x16xf32>
    %105 = vector.extract_strided_slice %9 {offsets = [2, 0, 0], sizes = [1, 16, 8], strides = [1, 1, 1]} : vector<4x16x8xf32> to vector<1x16x8xf32>
    %106 = vector.shape_cast %105 : vector<1x16x8xf32> to vector<16x8xf32>
    %cst_36 = arith.constant dense<0.000000e+00> : vector<8x8xf32>
    %107 = tpu.matmul %104, %106, %cst_36 {dimension_numbers = #tpu.dot_dimension_numbers<[1], [0], [0], [1], [0, 0, 1, 1], [], []>} : vector<8x16xf32>, vector<16x8xf32>, vector<8x8xf32> -> vector<8x8xf32>
    %108 = vector.extract_strided_slice %8 {offsets = [0, 24], sizes = [8, 8], strides = [1, 1]} : vector<8x32xf32> to vector<8x8xf32>
    %109 = vector.extract_strided_slice %10 {offsets = [3, 0, 0], sizes = [1, 8, 16], strides = [1, 1, 1]} : vector<4x8x16xf32> to vector<1x8x16xf32>
    %110 = vector.shape_cast %109 : vector<1x8x16xf32> to vector<8x16xf32>
    %cst_37 = arith.constant dense<0.000000e+00> : vector<8x16xf32>
    %111 = tpu.matmul %108, %110, %cst_37 {dimension_numbers = #tpu.dot_dimension_numbers<[1], [0], [0], [1], [0, 0, 1, 1], [], []>} : vector<8x8xf32>, vector<8x16xf32>, vector<8x16xf32> -> vector<8x16xf32>
    %112 = arith.mulf %108, %108 : vector<8x8xf32>
    %cst_38 = arith.constant dense<0.000000e+00> : vector<8xf32>
    %113 = vector.multi_reduction <add>, %112, %cst_38 [1] : vector<8x8xf32> to vector<8xf32>
    %114 = vector.shape_cast %113 : vector<8xf32> to vector<8x1xf32>
    %115 = vector.extract_strided_slice %11 {offsets = [3, 0], sizes = [1, 16], strides = [1, 1]} : vector<4x16xf32> to vector<1x16xf32>
    %116 = vector.broadcast %114 : vector<8x1xf32> to vector<8x16xf32>
    %117 = vector.broadcast %115 : vector<1x16xf32> to vector<8x16xf32>
    %118 = arith.addf %116, %117 : vector<8x16xf32>
    %cst_39 = arith.constant 2.000000e+00 : f32
    %119 = vector.broadcast %cst_39 : f32 to vector<8x16xf32>
    %120 = arith.mulf %119, %111 : vector<8x16xf32>
    %121 = arith.subf %118, %120 : vector<8x16xf32>
    %122 = tpu.iota {dimensions = array<i32: 1>} : vector<8x16xi32>
    %cst_40 = arith.constant dense<0x7F800000> : vector<8xf32>
    %123 = vector.multi_reduction <minimumf>, %121, %cst_40 [1] : vector<8x16xf32> to vector<8xf32>
    %124 = vector.shape_cast %123 : vector<8xf32> to vector<8x1xf32>
    %125 = vector.broadcast %124 : vector<8x1xf32> to vector<8x16xf32>
    %126 = arith.cmpf oeq, %121, %125 : vector<8x16xf32>
    %c16_i32_41 = arith.constant 16 : i32
    %127 = vector.broadcast %c16_i32_41 : i32 to vector<8x16xi32>
    %128 = arith.select %126, %122, %127 : vector<8x16xi1>, vector<8x16xi32>
    %cst_42 = arith.constant dense<2147483647> : vector<8xi32>
    %129 = vector.multi_reduction <minsi>, %128, %cst_42 [1] : vector<8x16xi32> to vector<8xi32>
    %130 = vector.shape_cast %129 : vector<8xi32> to vector<8x1xi32>
    %c15_i32_43 = arith.constant 15 : i32
    %131 = vector.broadcast %c15_i32_43 : i32 to vector<8x1xi32>
    %132 = arith.minsi %130, %131 : vector<8x1xi32>
    %133 = vector.broadcast %132 : vector<8x1xi32> to vector<8x16xi32>
    %134 = arith.cmpi eq, %133, %122 : vector<8x16xi32>
    %135 = arith.extui %134 : vector<8x16xi1> to vector<8x16xi32>
    %136 = arith.sitofp %135 : vector<8x16xi32> to vector<8x16xf32>
    %137 = vector.extract_strided_slice %9 {offsets = [3, 0, 0], sizes = [1, 16, 8], strides = [1, 1, 1]} : vector<4x16x8xf32> to vector<1x16x8xf32>
    %138 = vector.shape_cast %137 : vector<1x16x8xf32> to vector<16x8xf32>
    %cst_44 = arith.constant dense<0.000000e+00> : vector<8x8xf32>
    %139 = tpu.matmul %136, %138, %cst_44 {dimension_numbers = #tpu.dot_dimension_numbers<[1], [0], [0], [1], [0, 0, 1, 1], [], []>} : vector<8x16xf32>, vector<16x8xf32>, vector<8x8xf32> -> vector<8x8xf32>
    %140 = tpu.concatenate %43, %75, %107, %139 in 1 : vector<8x8xf32>, vector<8x8xf32>, vector<8x8xf32>, vector<8x8xf32> -> vector<8x32xf32>
    %c0_45 = arith.constant 0 : index
    %c0_46 = arith.constant 0 : index
    %141 = vector.load %arg8[%c0_45, %c0_46] : memref<32x32xf32, #tpu.memory_space<vmem>>, vector<32x32xf32>
    %cst_47 = arith.constant dense<0.000000e+00> : vector<8x32xf32>
    %142 = tpu.matmul %140, %141, %cst_47 {dimension_numbers = #tpu.dot_dimension_numbers<[1], [0], [0], [1], [0, 0, 1, 1], [], []>} : vector<8x32xf32>, vector<32x32xf32>, vector<8x32xf32> -> vector<8x32xf32>
    %c0_48 = arith.constant 0 : index
    %c0_49 = arith.constant 0 : index
    %143 = vector.load %arg9[%c0_48, %c0_49] : memref<1x32xf32, #tpu.memory_space<vmem>>, vector<1x32xf32>
    %144 = vector.broadcast %143 : vector<1x32xf32> to vector<8x32xf32>
    %145 = arith.addf %142, %144 : vector<8x32xf32>
    %cst_50 = arith.constant 0.000000e+00 : f32
    %146 = vector.broadcast %cst_50 : f32 to vector<8x32xf32>
    %147 = arith.maximumf %145, %146 : vector<8x32xf32>
    %c0_51 = arith.constant 0 : index
    %c0_52 = arith.constant 0 : index
    %148 = vector.load %arg10[%c0_51, %c0_52] : memref<32x4xf32, #tpu.memory_space<vmem>>, vector<32x4xf32>
    %cst_53 = arith.constant dense<0.000000e+00> : vector<8x4xf32>
    %149 = tpu.matmul %147, %148, %cst_53 {dimension_numbers = #tpu.dot_dimension_numbers<[1], [0], [0], [1], [0, 0, 1, 1], [], []>} : vector<8x32xf32>, vector<32x4xf32>, vector<8x4xf32> -> vector<8x4xf32>
    %c0_54 = arith.constant 0 : index
    %c0_55 = arith.constant 0 : index
    %150 = vector.load %arg11[%c0_54, %c0_55] : memref<1x4xf32, #tpu.memory_space<vmem>>, vector<1x4xf32>
    %151 = vector.broadcast %150 : vector<1x4xf32> to vector<8x4xf32>
    %152 = arith.addf %149, %151 : vector<8x4xf32>
    %153 = tpu.concatenate %152, %8, %140 in 1 : vector<8x4xf32>, vector<8x32xf32>, vector<8x32xf32> -> vector<8x68xf32>
    %cst_56 = arith.constant 0.000000e+00 : f32
    %154 = vector.broadcast %cst_56 : f32 to vector<8x60xf32>
    %155 = tpu.concatenate %153, %154 in 1 : vector<8x68xf32>, vector<8x60xf32> -> vector<8x128xf32>
    %c0_57 = arith.constant 0 : index
    %c0_58 = arith.constant 0 : index
    %156 = vector.load %arg12[%c0_57, %c0_58] : memref<8x128xf32, #tpu.memory_space<vmem>>, vector<8x128xf32>
    tpu.vector_store %arg12[%c0_57, %c0_58], %155 {strides = array<i32>} : memref<8x128xf32, #tpu.memory_space<vmem>>, vector<8x128xf32>,
    return
  }
  func.func @transform_0(%arg0: i32) -> (i32, i32) {
    %c0_i32 = arith.constant 0 : i32
    %c0_i32_0 = arith.constant 0 : i32
    return %arg0, %c0_i32 : i32, i32
  }
  func.func @transform_1(%arg0: i32) -> (i32, i32) {
    %c0_i32 = arith.constant 0 : i32
    %c0_i32_0 = arith.constant 0 : i32
    %c0_i32_1 = arith.constant 0 : i32
    return %c0_i32, %c0_i32_0 : i32, i32
  }
  func.func @transform_2(%arg0: i32) -> (i32, i32) {
    %c0_i32 = arith.constant 0 : i32
    %c0_i32_0 = arith.constant 0 : i32
    %c0_i32_1 = arith.constant 0 : i32
    return %c0_i32, %c0_i32_0 : i32, i32
  }
  func.func @transform_3(%arg0: i32) -> (i32, i32) {
    %c0_i32 = arith.constant 0 : i32
    %c0_i32_0 = arith.constant 0 : i32
    %c0_i32_1 = arith.constant 0 : i32
    return %c0_i32, %c0_i32_0 : i32, i32
  }
  func.func @transform_4(%arg0: i32) -> (i32, i32, i32) {
    %c0_i32 = arith.constant 0 : i32
    %c0_i32_0 = arith.constant 0 : i32
    %c0_i32_1 = arith.constant 0 : i32
    %c0_i32_2 = arith.constant 0 : i32
    return %c0_i32, %c0_i32_0, %c0_i32_1 : i32, i32, i32
  }
  func.func @transform_5(%arg0: i32) -> (i32, i32, i32) {
    %c0_i32 = arith.constant 0 : i32
    %c0_i32_0 = arith.constant 0 : i32
    %c0_i32_1 = arith.constant 0 : i32
    %c0_i32_2 = arith.constant 0 : i32
    return %c0_i32, %c0_i32_0, %c0_i32_1 : i32, i32, i32
  }
  func.func @transform_6(%arg0: i32) -> (i32, i32) {
    %c0_i32 = arith.constant 0 : i32
    %c0_i32_0 = arith.constant 0 : i32
    %c0_i32_1 = arith.constant 0 : i32
    return %c0_i32, %c0_i32_0 : i32, i32
  }
  func.func @transform_7(%arg0: i32) -> (i32, i32) {
    %c0_i32 = arith.constant 0 : i32
    %c0_i32_0 = arith.constant 0 : i32
    %c0_i32_1 = arith.constant 0 : i32
    return %c0_i32, %c0_i32_0 : i32, i32
  }
  func.func @transform_8(%arg0: i32) -> (i32, i32) {
    %c0_i32 = arith.constant 0 : i32
    %c0_i32_0 = arith.constant 0 : i32
    %c0_i32_1 = arith.constant 0 : i32
    return %c0_i32, %c0_i32_0 : i32, i32
  }
  func.func @transform_9(%arg0: i32) -> (i32, i32) {
    %c0_i32 = arith.constant 0 : i32
    %c0_i32_0 = arith.constant 0 : i32
    %c0_i32_1 = arith.constant 0 : i32
    return %c0_i32, %c0_i32_0 : i32, i32
  }
  func.func @transform_10(%arg0: i32) -> (i32, i32) {
    %c0_i32 = arith.constant 0 : i32
    %c0_i32_0 = arith.constant 0 : i32
    %c0_i32_1 = arith.constant 0 : i32
    return %c0_i32, %c0_i32_0 : i32, i32
  }
  func.func @transform_11(%arg0: i32) -> (i32, i32) {
    %c0_i32 = arith.constant 0 : i32
    %c0_i32_0 = arith.constant 0 : i32
    return %arg0, %c0_i32 : i32, i32
  }
}

</mosaic_0001>

<bundles_post_ra>
// kernel: tpu_custom_call.1
= control target key start
LH: loop header
LB: loop body
LE: loop exit
PB: predicated region body
PF: predicated region fallthrough
CT: control target
= control target key end

     0   :  { %s2113_s0 = inlined_call_operand.vmem [shape: f32[16,4], index: 0, kind: input, shape index: {}]   ;;  %s2114_s1 = inlined_call_operand.vmem [shape: f32[4,32], index: 1, kind: input, shape index: {}]   ;;  %s2115_s2 = inlined_call_operand.vmem [shape: f32[1,32], index: 2, kind: input, shape index: {}]   ;;  %s2116_s3 = inlined_call_operand.vmem [shape: f32[1,32], index: 3, kind: input, shape index: {}]   ;;  %s2117_s4 = inlined_call_operand.vmem [shape: f32[4,8,16], index: 4, kind: input, shape index: {}]   ;;  %s2118_s5 = inlined_call_operand.vmem [shape: f32[4,16,8], index: 5, kind: input, shape index: {}]   ;;  %s2119_s6 = inlined_call_operand.vmem [shape: f32[4,16], index: 6, kind: input, shape index: {}]   ;;  %s2120_s7 = inlined_call_operand.vmem [shape: f32[32,32], index: 7, kind: input, shape index: {}]   ;;  %s2121_s8 = inlined_call_operand.vmem [shape: f32[1,32], index: 8, kind: input, shape index: {}]   ;;  %s2122_s9 = inlined_call_operand.vmem [shape: f32[32,4], index: 9, kind: input, shape index: {}]   ;;  %s2123_s10 = inlined_call_operand.vmem [shape: f32[1,4], index: 10, kind: input, shape index: {}]   ;;  %s2124_s11 = inlined_call_operand.hbm [shape: f32[16,128], index: 11, kind: output, shape index: {}]  }
   0x1   :  { %2125 = sst [smem:[#allocation5_spill]] %s2113_s0 }
   0x2   :  { %16 = vsyncpa [#allocation3], 0 }
   0x3   :  { %18 = vsyncpa [#allocation3 + $0x1], 0  ;;  %s1851_s17 = smov 0   ;;  %s1853_s18 = smov 0  }
   0x4   :  { %s1855_s19 = smov 0   ;;  %s1857_s20 = smov 0  }
   0x5 LB: > { %s1872_s21 = sadd.s32 4294967295, %s1777_s20   ;;  %s1504_s22 = sadd.s32 4294967294, %s1777_s20   ;;  %s1777_s20 = sphi %s1857_s20, %s2132_s20   ;;  %s1773_s19 = sphi %s1855_s19, %s2131_s19   ;;  %s1769_s18 = sphi %s1853_s18, %s2130_s18   ;;  %s1765_s17 = sphi %s1851_s17, %s2129_s17  }
   0x6   : > { %s1876_s23 = sadd.s32 1, %s1777_s20   ;;  %s267_s24 = sadd.s32 1, %s1773_s19 }
   0x7   : > { %s264_s25 = ssub.s32 %s1777_s20, %s1876_s23  ;;  %p277_p0 = scmp.ne.s32.totalorder %s1773_s19, %s1769_s18 }
   0x8   : > { %p265_p1 = scmp.eq.s32.totalorder %s264_s25, 0  ;;  %p278_p2 = scmp.eq.s32.totalorder %s1872_s21, 1 }
   0x9   : > { %p283_p3 = scmp.ne.s32.totalorder %s1769_s18, %s1765_s17  ;;  %p284_p4 = scmp.eq.s32.totalorder %s1504_s22, 1 }
   0xa   : > { %s1887_s26 = scalar_select %p265_p1, %s1773_s19, %s267_s24  }
   0xb   : > { %p1889_p5 = por %p278_p2, %p277_p0  ;;  %p1893_p6 = por %p284_p4, %p283_p3 }
   0xc   : > { %p1507_p7 = scmp.ge.s32.totalorder %s1777_s20, 1  ;;  %p339_p8 = scmp.lt.s32.totalorder %s1777_s20, 3 }
   0xe   : > { %p340_p9 = pnand %p1507_p7, %p339_p8 }
   0xf   : > { %v383_v0 = vld [vmem:[%s2114_s1] sm:$0xf] (!%p340_p9)  ;;  %vm388_vm0 = vcmask (!%p340_p9), 1043456   ;;  %p378_p10 = scmp.lt.s32.totalorder (!%p340_p9), %s1872_s21, 1  ;;  %v1779_v1 = vmov (!%p340_p9), 0.0   ;;  %vm1780_vm1 = vmmov (!%p340_p9), 0   ;;  %v569_v24 = vlaneseq (!%p340_p9) }
  0x10   : > { %343 = sbr.rel (%p340_p9) target bundleno = 1802 (0x70a), region = 64  ;;  %1566 = vmatprep.subr.mxu0 (!%p340_p9), %v1779_v1  ;;  %1568 = vmatprep.mubr.msk.f32.mxu0 (!%p340_p9), %vm1780_vm1, %v1779_v1  ;;  %vm384_vm2 = vcmask (!%p340_p9), 31744   ;;  %s2128_s0 = sld [smem:[#allocation5_spill]] (!%p340_p9)  ;;  %v486_v3 = vld [vmem:[%s2117_s4] sm:$0xff] (!%p340_p9)  ;;  %vm491_vm3 = vcmask (!%p340_p9), 64512   ;;  %v487_v10 = vld [vmem:[%s2117_s4 + $0x8] sm:$0xff] (!%p340_p9) }
  0x11   : > { %1567 = vmatpush3.msk.msra.mxu0 (!%p340_p9), %vm388_vm0, %v383_v0  ;;  %1571 = vmatprep.subr.mxu1 (!%p340_p9), %v1779_v1  ;;  %v1512_v4 = vld [vmem:[%s2115_s2] ss:$0 sm:$0xff] (!%p340_p9)  ;;  %s1781_s15 = smov (!%p340_p9), 104   ;;  %s1783_s22 = smov (!%p340_p9), 112   ;;  %v488_v13 = vld [vmem:[%s2117_s4 + $0x10] sm:$0xff] (!%p340_p9)  ;;  %v489_v16 = vld [vmem:[%s2117_s4 + $0x18] sm:$0xff] (!%p340_p9) }
  0x12   : > { %1573 = vmatprep.mubr.msk.f32.mxu1 (!%p340_p9), %vm1780_vm1, %v1779_v1  ;;  %1572 = vmatpush3.msra.mxu1 (!%p340_p9), %v486_v3  ;;  %v1513_v6 = vld [vmem:[%s2116_s3] ss:$0 sm:$0xff] (!%p340_p9)  ;;  %v570_v25 = vshrl.u32 (!%p340_p9), %v569_v24, 7  ;;  %vm578_vm4 = vcmask (!%p340_p9), 130048   ;;  %v1968_v63 = vand.u32 (!%p340_p9), 127, %v569_v24  ;;  %s1785_s24 = smov (!%p340_p9), 8  }
  0x13   : > { %1583 = vmatprep.subr.mxu1 (!%p340_p9), %v1779_v1  ;;  %v490_v27 = vld [vmem:[%s2119_s6] sm:$0xf] (!%p340_p9)  ;;  %s1786_s25 = smov (!%p340_p9), 16   ;;  %s1787_s29 = smov (!%p340_p9), 24  }
  0x14   : > { %v571_v26 = vsub.s32 (!%p340_p9), 0, %v570_v25  ;;  %v760_v36 = vsub.s32 (!%p340_p9), 1, %v570_v25  ;;  %v945_v38 = vsub.s32 (!%p340_p9), 2, %v570_v25  ;;  %v1130_v44 = vsub.s32 (!%p340_p9), 3, %v570_v25  ;;  %s1788_s30 = smov (!%p340_p9), 4  }
  0x16   : > { %v572_v28 = vrot.slane (!%p340_p9), %v490_v27, %v571_v26  ;;  %v761_v37 = vrot.slane (!%p340_p9), %v490_v27, %v760_v36  ;;  %v946_v43 = vrot.slane (!%p340_p9), %v490_v27, %v945_v38  ;;  %v1131_v50 = vrot.slane (!%p340_p9), %v490_v27, %v1130_v44  ;;  %v478_v26 = vld [vmem:[%s2118_s5] sm:$0xff] (!%p340_p9)  ;;  %v479_v27 = vld [vmem:[%s2118_s5 + $0x8] sm:$0xff] (!%p340_p9) }
  0x17   : > { %s379_s12 = scalar_select %p378_p10, %s1872_s21, 1 }
  0x19   : > { %s1509_s13 = sshll.u32 %s379_s12, 3 }
  0x1a   : > { %s381_s16 = scalar_lea.vmem %s2128_s0, %s1509_s13  ;;  %s375_s13 = sand.u32 1, %s1769_s18  }
  0x1b   : > { %v382_v2 = vld [vmem:[%s381_s16] sm:$0xff]  ;;  %s1782_s16 = smov 120   ;;  %s1508_s14 = sshll.u32 %s375_s13, 3 }
  0x1c   : > { %1569 = vmatmul.mubr.msk.f32.vlgmr.msra.gmra.mrb[0].mxu0 %vm384_vm2, %v382_v2 }
  0x1d   : > { %1580 = vmatprep.mubr.msk.f32.mxu0 %vm1780_vm1, %v1779_v1 }
  0xef   : > { %v458_v5 = vpop.f32.mrb[0].mxu0 }
  0xf0   : > { %v469_v7 = vmul.f32 %v1512_v4, %v458_v5  ;;  %v1570_v8 = vpop.f32.mrb[1].mxu0 }
  0xf2   : > { %v1926_v9 = vadd.f32 %v1513_v6, %v469_v7 }
  0xf4   : > { %1048 = vrot.lane.b32.xlu1 %v1926_v9, %s1781_s15  ;;  %677 = vrot.lane.b32.xlu0 %v1926_v9, %s1782_s16  ;;  %v565_v11 = vmul.f32 %v1926_v9, %v1926_v9 }
  0xf5   : > { %1574 = vmatmul.mubr.msk.f32.vlgmr.msra.gmra.mrb[0].mxu1 %vm491_vm3, %v1926_v9 }
  0xf6   : > { %1584 = vmatpush3.msra.mxu1 %v487_v10  ;;  %1585 = vmatprep.mubr.msk.f32.mxu1 %vm1780_vm1, %v1779_v1  ;;  %v566_v12 = vsel %vm491_vm3, %v565_v11, 0.0 }
  0xf7   : > { %1595 = vmatprep.subr.mxu1 %v1779_v1 }
  0xf8   : > { %863 = vrot.lane.b32.xlu0 %v1926_v9, %s1783_s22  ;;  %752 = vrot.lane.b32.xlu1 %v565_v11, %s1782_s16  ;;  %s1789_s16 = smov 36  }
  0xfc   : > { %937 = vrot.lane.b32.xlu0 %v565_v11, %s1783_s22  ;;  %1122 = vrot.lane.b32.xlu1 %v565_v11, %s1781_s15  ;;  %s1531_s22 = sshll.u32 %s1872_s21, 7  ;;  %s1432_s21 = scalar_lea.sflag [#allocation3], %s375_s13 }
  0xfd   : > { %s2071_s12 = scalar_lea.hbm %s2124_s11, %s1531_s22  ;;  %s1790_s15 = smov [#allocation2]  }
 0x11b   : > { %567 = vadd.xlane.f32.xlu0 %v566_v12 }
 0x166   : > { %v1049_v14 = vpop.permute.xlu1 %1048  ;;  %v678_v15 = vpop.permute.xlu0 %677 }
 0x167   : > { %1586 = vmatmul.mubr.msk.f32.vlgmr.msra.gmra.mrb[2].mxu1 %vm491_vm3, %v678_v15 }
 0x168   : > { %1596 = vmatpush3.msra.mxu1 %v488_v13  ;;  %1597 = vmatprep.mubr.msk.f32.mxu1 %vm1780_vm1, %v1779_v1 }
 0x169   : > { %1607 = vmatprep.subr.mxu1 %v1779_v1 }
 0x16a   : > { %v864_v17 = vpop.permute.xlu0 %863  ;;  %v753_v18 = vpop.permute.xlu1 %752 }
 0x16b   : > { %1598 = vmatmul.mubr.msk.f32.vlgmr.msra.gmra.mrb[4].mxu1 %vm491_vm3, %v864_v17  ;;  %v755_v19 = vsel %vm491_vm3, %v753_v18, 0.0 }
 0x16c   : > { %1608 = vmatpush3.msra.mxu1 %v489_v16  ;;  %756 = vadd.xlane.f32.xlu1 %v755_v19 }
 0x16d   : > { %1609 = vmatprep.mubr.msk.f32.mxu1 %vm1780_vm1, %v1779_v1 }
 0x16e   : > { %v938_v20 = vpop.permute.xlu0 %937  ;;  %v1123_v22 = vpop.permute.xlu1 %1122 }
 0x16f   : > { %1610 = vmatmul.mubr.msk.f32.vlgmr.msra.gmra.mrb[6].mxu1 %vm491_vm3, %v1049_v14  ;;  %v940_v21 = vsel %vm491_vm3, %v938_v20, 0.0  ;;  %v1125_v23 = vsel %vm491_vm3, %v1123_v22, 0.0 }
 0x170   : > { %941 = vadd.xlane.f32.xlu0 %v940_v21  ;;  %1627 = vmatprep.mubr.msk.f32.mxu1 %vm1780_vm1, %v1779_v1 }
 0x174   : > { %1126 = vadd.xlane.f32.xlu0 %v1125_v23 }
 0x1a8   : > { %v568_v29 = vpop.xlane.xlu0 %567 }
 0x1a9   : > { %v573_v31 = vadd.f32 %v572_v28, %v568_v29  ;;  %v1642_v28 = vpack.c.bf16 %v479_v27, %v478_v26  ;;  %v1784_v29 = vmov 0.0|0.0  }
 0x1aa   : > { %1641 = vmatprep.subr.bf16.mxu0 %v1784_v29  ;;  %1653 = vmatprep.subr.bf16.mxu1 %v1784_v29 }
 0x1ab   : > { %1643 = vmatpush3.bf16.msra.mxu0 %v1642_v28 }
 0x1ac   : > { %1644 = vmatprep.subr.bf16.mxu0 %v1784_v29 }
 0x1c8   : > { %v561_v30 = vpop.f32.mrb[0].mxu1 }
 0x1c9   : > { %v574_v32 = vmul.f32 2.0, %v561_v30  ;;  %v1575_v33 = vpop.f32.mrb[1].mxu1 }
 0x1cb   : > { %v575_v34 = vsub.f32 %v573_v31, %v574_v32 }
 0x1cd   : > { %v579_v35 = vsel %vm578_vm4, %v575_v34, inf }
 0x1ce   : > { %580 = vmin.xlane.f32.xlu1 %v579_v35 }
 0x1f9   : > { %v757_v39 = vpop.xlane.xlu1 %756 }
 0x1fa   : > { %v762_v42 = vadd.f32 %v761_v37, %v757_v39 }
 0x1fd   : > { %v942_v40 = vpop.xlane.xlu0 %941 }
 0x1fe   : > { %v947_v49 = vadd.f32 %v946_v43, %v942_v40 }
 0x201   : > { %v1127_v54 = vpop.xlane.xlu0 %1126 }
 0x202   : > { %v1132_v57 = vadd.f32 %v1131_v50, %v1127_v54 }
 0x23a   : > { %v747_v41 = vpop.f32.mrb[2].mxu1 }
 0x23b   : > { %v763_v45 = vmul.f32 2.0, %v747_v41  ;;  %v1587_v46 = vpop.f32.mrb[3].mxu1 }
 0x23d   : > { %v764_v47 = vsub.f32 %v762_v42, %v763_v45 }
 0x23e   : > { %v933_v48 = vpop.f32.mrb[4].mxu1 }
 0x23f   : > { %v948_v51 = vmul.f32 2.0, %v933_v48  ;;  %v1599_v52 = vpop.f32.mrb[5].mxu1  ;;  %v765_v53 = vsel %vm578_vm4, %v764_v47, inf  ;;  %v481_v48 = vld [vmem:[%s2118_s5 + $0x18] sm:$0xff] }
 0x240   : > { %766 = vmin.xlane.f32.xlu0 %v765_v53 }
 0x241   : > { %v949_v55 = vsub.f32 %v947_v49, %v948_v51 }
 0x242   : > { %v1118_v56 = vpop.f32.mrb[6].mxu1 }
 0x243   : > { %v1133_v58 = vmul.f32 2.0, %v1118_v56  ;;  %v1611_v59 = vpop.f32.mrb[7].mxu1  ;;  %v950_v60 = vsel %vm578_vm4, %v949_v55, inf }
 0x244   : > { %951 = vmin.xlane.f32.xlu1 %v950_v60  ;;  %v483_v59 = vld [vmem:[%s2118_s5 + $0x28] sm:$0xff] }
 0x245   : > { %v1134_v61 = vsub.f32 %v1132_v57, %v1133_v58  ;;  %v482_v58 = vld [vmem:[%s2118_s5 + $0x20] sm:$0xff] }
 0x247   : > { %v1135_v62 = vsel %vm578_vm4, %v1134_v61, inf }
 0x248   : > { %1136 = vmin.xlane.f32.xlu0 %v1135_v62 }
 0x25b   : > { %v581_v0 = vpop.xlane.xlu1 %580 }
 0x25c   : > { %vm582_vm5 = vcmp.eq.f32.partialorder %v575_v34, %v581_v0 }
 0x25d   : > { %v583_v2 = vsel %vm582_vm5, %v1968_v63, 16 }
 0x25e   : > { %v584_v3 = vsel %vm578_vm4, %v583_v2, 2147483647 }
 0x25f   : > { %v586_v4 = vshra.s32 %v584_v3, 16  ;;  %v585_v22 = vand.u32 65535, %v584_v3  ;;  %v1648_v3 = vpack.c.bf16 %v483_v59, %v482_v58 }
 0x261   : > { %v588_v5 = vcvt.s32.f32 %v586_v4  ;;  %v587_v24 = vcvt.s32.f32 %v585_v22  ;;  %v1251_v22 = vld [vmem:[%s2120_s7 + $0x10] sm:$0xff] }
 0x263   : > { %589 = vmin.xlane.f32.xlu1 %v588_v5 }
 0x2cd   : > { %v767_v6 = vpop.xlane.xlu0 %766 }
 0x2ce   : > { %vm768_vm6 = vcmp.eq.f32.partialorder %v764_v47, %v767_v6  ;;  %v480_v47 = vld [vmem:[%s2118_s5 + $0x10] sm:$0xff]  ;;  %v485_v6 = vld [vmem:[%s2118_s5 + $0x38] sm:$0xff] }
 0x2cf   : > { %v769_v7 = vsel %vm768_vm6, %v1968_v63, 16  ;;  %v1645_v50 = vpack.c.bf16 %v481_v48, %v480_v47 }
 0x2d0   : > { %v770_v8 = vsel %vm578_vm4, %v769_v7, 2147483647 }
 0x2d1   : > { %v952_v10 = vpop.xlane.xlu1 %951  ;;  %v772_v11 = vshra.s32 %v770_v8, 16  ;;  %v771_v30 = vand.u32 65535, %v770_v8 }
 0x2d2   : > { %vm953_vm7 = vcmp.eq.f32.partialorder %v949_v55, %v952_v10 }
 0x2d3   : > { %v954_v12 = vsel %vm953_vm7, %v1968_v63, 16  ;;  %v774_v13 = vcvt.s32.f32 %v772_v11  ;;  %v773_v32 = vcvt.s32.f32 %v771_v30 }
 0x2d4   : > { %v955_v14 = vsel %vm578_vm4, %v954_v12, 2147483647 }
 0x2d5   : > { %775 = vmin.xlane.f32.xlu0 %v774_v13  ;;  %v1137_v15 = vpop.xlane.xlu0 %1136  ;;  %v957_v16 = vshra.s32 %v955_v14, 16  ;;  %v956_v33 = vand.u32 65535, %v955_v14 }
 0x2d6   : > { %vm1138_vm8 = vcmp.eq.f32.partialorder %v1134_v61, %v1137_v15 }
 0x2d7   : > { %v1139_v17 = vsel %vm1138_vm8, %v1968_v63, 16  ;;  %v959_v18 = vcvt.s32.f32 %v957_v16  ;;  %v958_v36 = vcvt.s32.f32 %v956_v33 }
 0x2d8   : > { %v1140_v19 = vsel %vm578_vm4, %v1139_v17, 2147483647 }
 0x2d9   : > { %960 = vmin.xlane.f32.xlu1 %v959_v18  ;;  %v1142_v20 = vshra.s32 %v1140_v19, 16  ;;  %v1141_v37 = vand.u32 65535, %v1140_v19 }
 0x2db   : > { %v1144_v21 = vcvt.s32.f32 %v1142_v20  ;;  %v1143_v40 = vcvt.s32.f32 %v1141_v37  ;;  %v1249_v20 = vld [vmem:[%s2120_s7] sm:$0xff] }
 0x2dd   : > { %1145 = vmin.xlane.f32.xlu0 %v1144_v21 }
 0x2f0   : > { %v590_v23 = vpop.xlane.xlu1 %589 }
 0x2f1   : > { %vm591_vm9 = vcmp.eq.f32.partialorder %v588_v5, %v590_v23  ;;  %v596_v42 = vcvt.f32.s32 %v590_v23  ;;  %v484_v5 = vld [vmem:[%s2118_s5 + $0x30] sm:$0xff] }
 0x2f2   : > { %v592_v25 = vsel %vm591_vm9, %v587_v24, inf  ;;  %vm1260_vm9 = vcmask 261120  }
 0x2f3   : > { %593 = vmin.xlane.f32.xlu1 %v592_v25  ;;  %v597_v44 = vshll.u32 %v596_v42, 16 }
 0x362   : > { %v776_v31 = vpop.xlane.xlu0 %775 }
 0x363   : > { %vm777_vm10 = vcmp.eq.f32.partialorder %v774_v13, %v776_v31  ;;  %v782_v52 = vcvt.f32.s32 %v776_v31  ;;  %v1651_v13 = vpack.c.bf16 %v485_v6, %v484_v5  ;;  %v1335_v31 = vld [vmem:[%s2122_s9] sm:$0xff] }
 0x364   : > { %v778_v34 = vsel %vm777_vm10, %v773_v32, inf  ;;  %v1336_v32 = vld [vmem:[%s2122_s9 + $0x8] sm:$0xff] }
 0x365   : > { %779 = vmin.xlane.f32.xlu0 %v778_v34  ;;  %v783_v54 = vshll.u32 %v782_v52, 16  ;;  %v1660_v33 = vpack.c.bf16 %v1336_v32, %v1335_v31 }
 0x366   : > { %v961_v35 = vpop.xlane.xlu1 %960 }
 0x367   : > { %vm962_vm11 = vcmp.eq.f32.partialorder %v959_v18, %v961_v35  ;;  %v967_v55 = vcvt.f32.s32 %v961_v35 }
 0x368   : > { %v963_v38 = vsel %vm962_vm11, %v958_v36, inf }
 0x369   : > { %964 = vmin.xlane.f32.xlu1 %v963_v38  ;;  %v968_v61 = vshll.u32 %v967_v55, 16 }
 0x36a   : > { %v1146_v39 = vpop.xlane.xlu0 %1145 }
 0x36b   : > { %vm1147_vm12 = vcmp.eq.f32.partialorder %v1144_v21, %v1146_v39  ;;  %v1152_v62 = vcvt.f32.s32 %v1146_v39  ;;  %v1250_v21 = vld [vmem:[%s2120_s7 + $0x8] sm:$0xff]  ;;  %v1337_v39 = vld [vmem:[%s2122_s9 + $0x10] sm:$0xff] }
 0x36c   : > { %v1148_v41 = vsel %vm1147_vm12, %v1143_v40, inf }
 0x36d   : > { %1149 = vmin.xlane.f32.xlu0 %v1148_v41  ;;  %v1153_v10 = vshll.u32 %v1152_v62, 16  ;;  %v1526_v41 = vld [vmem:[%s2121_s8] ss:$0 sm:$0xff] }
 0x380   : > { %v594_v43 = vpop.xlane.xlu1 %593 }
 0x381   : > { %v595_v45 = vcvt.f32.s32 %v594_v43 }
 0x383   : > { %v598_v46 = vadd.s32 %v597_v44, %v595_v45 }
 0x385   : > { %vm599_vm13 = vcmp.lt.s32.totalorder %v598_v46, 15 }
 0x386   : > { %v600_v49 = vsel %vm599_vm13, %v598_v46, 15  ;;  %v1528_v46 = vld [vmem:[%s2123_s10] ss:$0 sm:$0xff] }
 0x387   : > { %vm601_vm14 = vcmp.eq.s32.totalorder %v600_v49, %v1968_v63 }
 0x388   : > { %v1515_v51 = vsel %vm601_vm14, 1.0, %v1779_v1 }
 0x389   : > { %1581 = vmatmul.mubr.msk.f32.vlgmr.msra.gmra.mrb[2].mxu0 %vm578_vm4, %v1515_v51 }
 0x38a   : > { %1646 = vmatpush3.bf16.msra.mxu0 %v1645_v50  ;;  %1592 = vmatprep.mubr.msk.f32.mxu0 %vm1780_vm1, %v1779_v1 }
 0x38b   : > { %1647 = vmatprep.subr.bf16.mxu0 %v1784_v29 }
 0x3f2   : > { %v780_v53 = vpop.xlane.xlu0 %779 }
 0x3f3   : > { %v781_v56 = vcvt.f32.s32 %v780_v53 }
 0x3f5   : > { %v784_v57 = vadd.s32 %v783_v54, %v781_v56 }
 0x3f6   : > { %v965_v60 = vpop.xlane.xlu1 %964 }
 0x3f7   : > { %vm785_vm15 = vcmp.lt.s32.totalorder %v784_v57, 15  ;;  %v966_v0 = vcvt.f32.s32 %v965_v60 }
 0x3f8   : > { %v786_v2 = vsel %vm785_vm15, %v784_v57, 15 }
 0x3f9   : > { %vm787_vm0 = vcmp.eq.s32.totalorder %v786_v2, %v1968_v63  ;;  %v969_v4 = vadd.s32 %v968_v61, %v966_v0 }
 0x3fa   : > { %v1150_v7 = vpop.xlane.xlu0 %1149  ;;  %v1518_v8 = vsel %vm787_vm0, 1.0, %v1779_v1 }
 0x3fb   : > { %vm970_vm5 = vcmp.lt.s32.totalorder %v969_v4, 15  ;;  %v1151_v11 = vcvt.f32.s32 %v1150_v7  ;;  %1593 = vmatmul.mubr.msk.f32.vlgmr.msra.gmra.mrb[4].mxu0 %vm578_vm4, %v1518_v8 }
 0x3fc   : > { %v971_v12 = vsel %vm970_vm5, %v969_v4, 15  ;;  %1649 = vmatpush3.bf16.msra.mxu0 %v1648_v3  ;;  %1604 = vmatprep.mubr.msk.f32.mxu0 %vm1780_vm1, %v1779_v1 }
 0x3fd   : > { %vm972_vm6 = vcmp.eq.s32.totalorder %v971_v12, %v1968_v63  ;;  %v1154_v14 = vadd.s32 %v1153_v10, %v1151_v11  ;;  %1650 = vmatprep.subr.bf16.mxu0 %v1784_v29 }
 0x3fe   : > { %v1521_v15 = vsel %vm972_vm6, 1.0, %v1779_v1 }
 0x3ff   : > { %vm1155_vm7 = vcmp.lt.s32.totalorder %v1154_v14, 15  ;;  %1605 = vmatmul.mubr.msk.f32.vlgmr.msra.gmra.mrb[6].mxu0 %vm578_vm4, %v1521_v15 }
 0x400   : > { %v1156_v16 = vsel %vm1155_vm7, %v1154_v14, 15  ;;  %1652 = vmatpush3.bf16.msra.mxu0 %v1651_v13  ;;  %1616 = vmatprep.mubr.msk.f32.mxu0 %vm1780_vm1, %v1779_v1 }
 0x401   : > { %vm1157_vm8 = vcmp.eq.s32.totalorder %v1156_v16, %v1968_v63  ;;  %1659 = vmatprep.subr.bf16.mxu0 %v1784_v29  ;;  %v1654_v63 = vpack.c.bf16 %v1250_v21, %v1249_v20 }
 0x402   : > { %v1524_v17 = vsel %vm1157_vm8, 1.0, %v1779_v1 }
 0x403   : > { %1617 = vmatmul.mubr.msk.f32.vlgmr.msra.gmra.mrb[8].mxu0 %vm578_vm4, %v1524_v17  ;;  %1655 = vmatpush3.bf16.msra.mxu1 %v1654_v63 }
 0x404   : > { %1638 = vmatprep.mubr.msk.f32.mxu0 %vm1780_vm1, %v1779_v1  ;;  %1656 = vmatprep.subr.bf16.mxu1 %v1784_v29  ;;  %v1252_v1 = vld [vmem:[%s2120_s7 + $0x18] sm:$0xff]  ;;  %vm1247_vm1 = vcmask 195584  }
 0x405   : > { %v1657_v23 = vpack.c.bf16 %v1252_v1, %v1251_v22  ;;  %1661 = vmatpush3.bf16.msra.mxu0 %v1660_v33 }
 0x406   : > { %1662 = vmatprep.subr.bf16.mxu0 %v1784_v29  ;;  %v1338_v29 = vld [vmem:[%s2122_s9 + $0x18] sm:$0xff] }
 0x407   : > { %1658 = vmatpush3.bf16.msra.mxu1 %v1657_v23  ;;  %v1663_v40 = vpack.c.bf16 %v1338_v29, %v1337_v39 }
 0x409   : > { %1664 = vmatpush3.bf16.msra.mxu0 %v1663_v40 }
 0x45c   : > { %v673_v18 = vpop.f32.mrb[2].mxu0 }
 0x45d   : > { %v1582_v19 = vpop.f32.mrb[3].mxu0 }
 0x4ce   : > { %v859_v24 = vpop.f32.mrb[4].mxu0 }
 0x4cf   : > { %1234 = vrot.lane.b32.xlu1 %v859_v24, %s1785_s24  ;;  %v1594_v25 = vpop.f32.mrb[5].mxu0  ;;  %s377_s24 = scalar_lea.vmem [#allocation2], %s1508_s14 }
 0x4d2   : > { %v1044_v26 = vpop.f32.mrb[6].mxu0 }
 0x4d3   : > { %1238 = vrot.lane.b32.xlu0 %v1044_v26, %s1786_s25  ;;  %v1606_v27 = vpop.f32.mrb[7].mxu0  ;;  %s1445_s25 = sshll.u32 %s377_s24, 4  ;;  %s2073_s25 = int_to_ptr.vmem [resolvable:$true] %s1445_s25 }
 0x4d4   : > { %s1715_s14 = scalar_lea.vmem %s2073_s25, 128 }
 0x4d5   : > { %p1716_p11 = scmp.ne.s32.totalorder %s2073_s25, %s1715_s14 }
 0x4d6   : > { %v1229_v28 = vpop.f32.mrb[8].mxu0 }
 0x4d7   : > { %1242 = vrot.lane.b32.xlu1 %v1229_v28, %s1787_s29  ;;  %v1618_v30 = vpop.f32.mrb[9].mxu0  ;;  %p1717_p12 = pnand %p1716_p11, %p1889_p5 }
 0x4d9   : > { %p1718_p13 = pneg %p1717_p12 }
 0x4db   : > { %1419 = vrot.lane.b32.xlu1 %v1926_v9, %s1788_s30 }
 0x541   : > { %v1235_v34 = vpop.permute.xlu1 %1234 }
 0x542   : > { %v1245_v36 = vsel %vm491_vm3, %v673_v18, %v1235_v34  ;;  %vm1426_vm3 = vcmask 293888  }
 0x545   : > { %v1239_v35 = vpop.permute.xlu0 %1238 }
 0x546   : > { %v1246_v9 = vsel %vm578_vm4, %v1245_v36, %v1239_v35  ;;  %vm1428_vm4 = vcmask 556032  }
 0x549   : > { %v1243_v37 = vpop.permute.xlu1 %1242 }
 0x54a   : > { %v1248_v38 = vsel %vm1247_vm1, %v1246_v9, %v1243_v37 }
 0x54b   : > { %1422 = vrot.lane.b32.xlu0 %v1248_v38, %s1789_s16  ;;  %1628 = vmatmul.mubr.msk.f32.vlgmr.msra.gmra.mrb[8].mxu1 %vm1260_vm9, %v1248_v38  ;;  %s1719_s16 = sshll.u32 %s1790_s15, 4  ;;  %s1720_s16 = int_to_ptr.vmem [resolvable:$false] %s1719_s16 }
 0x54c   : > { %s1721_s0 = scalar_lea.vmem %s1720_s16, 256  ;;  %p1722_p0 = scmp.lt.s32.totalorder %s2073_s25, %s1720_s16 }
 0x54d   : > { %v1420_v50 = vpop.permute.xlu1 %1419  ;;  %p1723_p1 = scmp.lt.s32.totalorder %s1721_s0, %s1715_s14 }
 0x54f   : > { %p1724_p2 = por %p1723_p1, %p1722_p0 }
 0x551   : > { %p1725_p3 = pnand %p1724_p2, %p1718_p13 }
 0x5bd   : > { %v1423_v51 = vpop.permute.xlu0 %1422 }
 0x61e   : > { %v1330_v42 = vpop.f32.mrb[8].mxu1 }
 0x61f   : > { %v1331_v43 = vadd.f32 %v1526_v41, %v1330_v42  ;;  %v1629_v44 = vpop.f32.mrb[9].mxu1 }
 0x621   : > { %v1334_v45 = vmax.f32 %v1331_v43, 0.0 }
 0x623   : > { %1639 = vmatmul.mubr.msk.f32.vlgmr.msra.gmra.mrb[10].mxu0 %vm1260_vm9, %v1334_v45 }
 0x6f6   : > { %v1415_v47 = vpop.f32.mrb[10].mxu0 }
 0x6f7   : > { %v1416_v48 = vadd.f32 %v1528_v46, %v1415_v47  ;;  %v1640_v49 = vpop.f32.mrb[11].mxu0 }
 0x6f9   : > { %v1425_v52 = vsel %vm384_vm2, %v1416_v48, %v1420_v50 }
 0x6fa   : > { %v1427_v53 = vsel %vm1426_vm3, %v1425_v52, %v1423_v51 }
 0x6fb   : > { %v1429_v54 = vsel %vm1428_vm4, %v1427_v53, 0.0 }
 0x6fc   : > { %1430 = vst [vmem:[%s377_s24] sm:$0xff] %v1429_v54 }
 0x6fd   : > { %1728 = shalt.err (!%p1725_p3)
}
 0x6fe   : > { %s1729_s13 = scalar_lea.hbm %s2071_s12, 128  ;;  %s1733_s29 = scalar_lea.hbm %s2124_s11, 256 }
 0x6ff   : > { %p1730_p4 = scmp.ne.s32.totalorder %s2071_s12, %s1729_s13  ;;  %p1734_p9 = scmp.lt.u32.totalorder %s2071_s12, %s2124_s11 }
 0x700   : > { %p1735_p10 = scmp.lt.u32.totalorder %s1733_s29, %s1729_s13  ;;  %p1737_p12 = scmp.lt.u32.totalorder %s1729_s13, %s2071_s12 }
 0x701   : > { %p1731_p7 = pnand %p1730_p4, %p1889_p5 }
 0x702   : > { %p1736_p11 = por %p1735_p10, %p1734_p9 }
 0x703   : > { %p1732_p8 = pneg %p1731_p7 }
 0x704   : > { %p1738_p13 = por %p1737_p12, %p1736_p11 }
 0x706   : > { %p1739_p0 = pnand %p1738_p13, %p1732_p8 }
 0x708   : > { %1742 = shalt.err (!%p1739_p0)
}
 0x709   : > { %1665 = dma.vmem_to_hbm [thread:$0]  (%p1889_p5), %s2073_s25, 128, %s2071_s12, %s1432_s21  }
 0x70a PF: > { %p1671_p1 = scmp.ge.s32.totalorder %s1777_s20, 2  ;;  %s1457_s0 = sand.u32 1, %s1765_s17  }
 0x70b   : > { %s1458_s14 = scalar_lea.sflag [#allocation3], %s1457_s0 }
 0x70c   : > { %p1668_p2 = pnand %p1671_p1, %p1893_p6 }
 0x70e   : > { %1760 = dma.done.wait (!%p1668_p2), %s1458_s14, 128  }
 0x70f   : > { %1762 = vsyncadd (!%p1668_p2), %s1458_s14, 4294967168  ;;  %p21_p3 = scmp.ge.s32.totalorder %s1876_s23, 4   ;;  %s2129_s17 = smov %s1769_s18 }
 0x710   : > { %s2130_s18 = smov %s1773_s19  ;;  %s2131_s19 = smov %s1887_s26 }
 0x711   : > { %s2132_s20 = smov %s1876_s23  ;;  %23 = sbr.rel (!%p21_p3) target bundleno = 5 (0x5), region = 99 }
 0x718   :  { %1463 = vsyncpa [#allocation3], 1 }
 0x719   :  { %1465 = vsyncpa [#allocation3 + $0x1], 1 }

</bundles_post_ra>
